<compile_context>
chip_gen: v5e
topology: v5e:2x2
jax: 0.10.0
libtpu: 0.0.40
codegen_flags: <defaults>
</compile_context>

<pallas_src>
import jax
import jax.numpy as jnp
from jax import lax
from jax.experimental import pallas as pl
from jax.experimental.pallas import tpu as pltpu

NUM_CLASSES = 10
LANE = 128
CLS_PAD = 16          # 10 classes padded to 16 sublanes for the transposed output


def mlp_kernel(x_ref,
               w0_ref, b0_ref, w1_ref, b1_ref, w2_ref, b2_ref,
               w3_ref, b3_ref, w4_ref, b4_ref, w5t_ref, b5t_ref,
               o_ref):
    # Whole-network fused forward for one batch-row tile.
    h = x_ref[...]                       # (TB, image_size) bf16

    def dense_relu(h_bf16, w_ref, b_ref):
        y = jnp.dot(h_bf16, w_ref[...],
                    preferred_element_type=jnp.float32) + b_ref[...]
        return jnp.maximum(y, 0.0).astype(jnp.bfloat16)

    h = dense_relu(h, w0_ref, b0_ref)    # (TB, 128)
    h = dense_relu(h, w1_ref, b1_ref)    # (TB, 128)  (64 real + zero pad)
    h = dense_relu(h, w2_ref, b2_ref)    # (TB, 128)  (10 real + zero pad)
    h = dense_relu(h, w3_ref, b3_ref)    # (TB, 128)
    h = dense_relu(h, w4_ref, b4_ref)    # (TB, 128)

    # Final linear, computed transposed: (CLS_PAD, 128) @ (TB, 128)^T -> (CLS_PAD, TB).
    # Padded class rows of w5t are zero; their bias rows carry -1e30, which masks
    # them out of the log_softmax (exp underflows to exactly 0, no inf-inf).
    logits_t = lax.dot_general(
        w5t_ref[...], h,
        dimension_numbers=(((1,), (1,)), ((), ())),
        preferred_element_type=jnp.float32) + b5t_ref[...]

    m = jnp.max(logits_t, axis=0, keepdims=True)          # (1, TB)
    s = logits_t - m
    lse = jnp.log(jnp.sum(jnp.exp(s), axis=0, keepdims=True))
    o_ref[...] = (s - lse).astype(o_ref.dtype)             # (CLS_PAD, TB)


def _round_up(n, m):
    return ((n + m - 1) // m) * m


def pad_params_for_kernel(params, image_size):
    """Zero-pad hidden widths to 128 lanes; weights stored bf16, biases f32.

    Layer 5 is stored transposed as (CLS_PAD, 128) with the class mask baked
    into the padded bias rows (-1e30)."""
    padded = []
    for idx, (w, b) in enumerate(params):
        fan_in, fan_out = w.shape
        if idx < 5:
            in_p = image_size if idx == 0 else LANE
            wp = jnp.zeros((in_p, LANE), jnp.float32).at[:fan_in, :fan_out].set(w)
            bp = jnp.zeros((1, LANE), jnp.float32).at[:, :fan_out].set(
                jnp.reshape(b, (1, -1)))
            padded.append((wp.astype(jnp.bfloat16), bp))
        else:
            wp = jnp.zeros((CLS_PAD, LANE), jnp.float32).at[:fan_out, :fan_in].set(w.T)
            bp = jnp.full((CLS_PAD, 1), -1e30, jnp.float32).at[:fan_out, :].set(
                jnp.reshape(b, (-1, 1)))
            padded.append((wp.astype(jnp.bfloat16), bp))
    return padded


def _choose_tiling(rows, tile_rows, image_size):
    """Pick (eff_tile, padded_rows, n_tiles).

    - Caps the tile so the double-buffered bf16 x stream stays well inside the
      scoped-VMEM default on every generation (v7x has only 64 MiB physical).
    - Splits large batches into >= 2 tiles so v7x's two TensorCores both work.
    - Uses a near-balanced 128-multiple tile to limit worst-case row padding.
    """
    vmem_cap_rows = max(128, ((8 << 20) // max(1, image_size * 2)) // 128 * 128)
    tile_rows = max(128, min(tile_rows, vmem_cap_rows))

    n_tiles = pl.cdiv(rows, tile_rows)
    if n_tiles == 1 and rows >= 1024:
        n_tiles = 2
    if n_tiles == 1:
        eff = _round_up(rows, 16)            # single resident tile (tiny batch)
        return eff, eff, 1
    eff = _round_up(pl.cdiv(rows, n_tiles), 128)
    return eff, eff * n_tiles, n_tiles


def model_e_forward(x, params, image_size, tile_rows=1024):
    # Flatten exactly like x.view(-1, image_size); stream x as bf16.
    rows = x.size // image_size
    x2d = jnp.asarray(x, jnp.float32).reshape(rows, image_size).astype(jnp.bfloat16)

    eff_tile, padded_rows, n_tiles = _choose_tiling(rows, tile_rows, image_size)
    if padded_rows != rows:
        x2d = jnp.pad(x2d, ((0, padded_rows - rows), (0, 0)))

    padded_params = pad_params_for_kernel(params, image_size)
    flat_params = [a for wb in padded_params for a in wb]

    x_spec = pl.BlockSpec((eff_tile, image_size), lambda i: (i, 0))
    # Weights/biases: one full-array block each, constant index -> VMEM resident.
    param_specs = [pl.BlockSpec(p.shape, lambda i: (0, 0)) for p in flat_params]
    out_spec = pl.BlockSpec((CLS_PAD, eff_tile), lambda i: (0, i))

    out = pl.pallas_call(
        mlp_kernel,
        out_shape=jax.ShapeDtypeStruct((CLS_PAD, padded_rows), jnp.float32),
        grid_spec=pltpu.PrefetchScalarGridSpec(
            num_scalar_prefetch=0,
            grid=(n_tiles,),
            in_specs=[x_spec] + param_specs,
            out_specs=out_spec,
        ),
        compiler_params=pltpu.CompilerParams(
            dimension_semantics=("parallel",)),
    )(x2d, *flat_params)

    # Tiny final transpose + slice: drop padded classes / rows.
    return out[:NUM_CLASSES, :rows].T


def init_params(key, image_size):
    # Deterministic init mimicking PyTorch Linear defaults (uniform +/- 1/sqrt(fan_in)).
    # Weights stored transposed vs. PyTorch: (in_features, out_features).
    dims = [(image_size, 128), (128, 64), (64, 10), (10, 10), (10, 10), (10, 10)]
    params = []
    for (fan_in, fan_out) in dims:
        key, kw, kb = jax.random.split(key, 3)
        bound = 1.0 / jnp.sqrt(fan_in)
        w = jax.random.uniform(kw, (fan_in, fan_out), jnp.float32, -bound, bound)
        b = jax.random.uniform(kb, (1, fan_out), jnp.float32, -bound, bound)
        params.append((w, b))
    return params


def reference_forward(x, params, image_size, mm_dtype=jnp.float32):
    # Pure-JAX reference matching the PyTorch module; mm_dtype controls the
    # matmul operand precision (bf16 to mirror the kernel's MXU path).
    rows = x.size // image_size
    h = jnp.asarray(x, jnp.float32).reshape(rows, image_size)
    for i, (w, b) in enumerate(params):
        h = jnp.dot(h.astype(mm_dtype), w.astype(mm_dtype),
                    preferred_element_type=jnp.float32) + jnp.reshape(b, (1, -1))
        if i < 5:
            h = jnp.maximum(h, 0.0)
    return jax.nn.log_softmax(h, axis=-1)


if __name__ == "__main__":
    image_size = 256  # x.view(-1, 256) gives 8 rows from (2, 4, 16, 16)
    key = jax.random.PRNGKey(0)
    kx, kp = jax.random.split(key)

    x = jax.random.normal(kx, (2, 4, 16, 16), dtype=jnp.float32)  # NCHW input
    params = init_params(kp, image_size)

    out = model_e_forward(x, params, image_size)
    jax.block_until_ready(out)

    # Correctness checks: shape, prob-space row sums, tight match vs a bf16-matmul
    # reference (same precision path as the kernel), loose match vs pure-f32 ref.
    ref_bf16 = reference_forward(x, params, image_size, jnp.bfloat16)
    ref_f32 = reference_forward(x, params, image_size, jnp.float32)
    probs_sum = jnp.sum(jnp.exp(out), axis=-1)
    assert out.shape == (8, 10)
    assert bool(jnp.all(jnp.abs(probs_sum - 1.0) < 1e-4))
    assert bool(jnp.all(jnp.abs(out - ref_bf16) < 2e-3))
    assert bool(jnp.all(jnp.abs(out - ref_f32) < 0.25))  # bf16-MXU tolerance

    print("KERNEL_OK")
</pallas_src>

<mosaic_0001>
module attributes {stable_mosaic.version = 11 : i64} {
  func.func @mlp_kernel(%arg0: i32, %arg1: memref<16x256xbf16, #tpu.memory_space<vmem>>, %arg2: memref<256x128xbf16, #tpu.memory_space<vmem>>, %arg3: memref<1x128xf32, #tpu.memory_space<vmem>>, %arg4: memref<128x128xbf16, #tpu.memory_space<vmem>>, %arg5: memref<1x128xf32, #tpu.memory_space<vmem>>, %arg6: memref<128x128xbf16, #tpu.memory_space<vmem>>, %arg7: memref<1x128xf32, #tpu.memory_space<vmem>>, %arg8: memref<128x128xbf16, #tpu.memory_space<vmem>>, %arg9: memref<1x128xf32, #tpu.memory_space<vmem>>, %arg10: memref<128x128xbf16, #tpu.memory_space<vmem>>, %arg11: memref<1x128xf32, #tpu.memory_space<vmem>>, %arg12: memref<16x128xbf16, #tpu.memory_space<vmem>>, %arg13: memref<16x1xf32, #tpu.memory_space<vmem>>, %arg14: memref<16x16xf32, #tpu.memory_space<vmem>>) attributes {dimension_semantics = [#tpu.dimension_semantics<parallel>], iteration_bounds = array<i64: 1>, scalar_prefetch = 0 : i64, scratch_operands = 0 : i64, tpu.core_type = #tpu.core_type<tc>, window_params = [{transform_indices = @transform_0, window_bounds = array<i64: 16, 256>}, {pipeline_mode = #tpu.pipeline_mode<synchronous>, transform_indices = @transform_1, window_bounds = array<i64: 256, 128>}, {pipeline_mode = #tpu.pipeline_mode<synchronous>, transform_indices = @transform_2, window_bounds = array<i64: 1, 128>}, {pipeline_mode = #tpu.pipeline_mode<synchronous>, transform_indices = @transform_3, window_bounds = array<i64: 128, 128>}, {pipeline_mode = #tpu.pipeline_mode<synchronous>, transform_indices = @transform_4, window_bounds = array<i64: 1, 128>}, {pipeline_mode = #tpu.pipeline_mode<synchronous>, transform_indices = @transform_5, window_bounds = array<i64: 128, 128>}, {pipeline_mode = #tpu.pipeline_mode<synchronous>, transform_indices = @transform_6, window_bounds = array<i64: 1, 128>}, {pipeline_mode = #tpu.pipeline_mode<synchronous>, transform_indices = @transform_7, window_bounds = array<i64: 128, 128>}, {pipeline_mode = #tpu.pipeline_mode<synchronous>, transform_indices = @transform_8, window_bounds = array<i64: 1, 128>}, {pipeline_mode = #tpu.pipeline_mode<synchronous>, transform_indices = @transform_9, window_bounds = array<i64: 128, 128>}, {pipeline_mode = #tpu.pipeline_mode<synchronous>, transform_indices = @transform_10, window_bounds = array<i64: 1, 128>}, {pipeline_mode = #tpu.pipeline_mode<synchronous>, transform_indices = @transform_11, window_bounds = array<i64: 16, 128>}, {pipeline_mode = #tpu.pipeline_mode<synchronous>, transform_indices = @transform_12, window_bounds = array<i64: 16, 1>}, {transform_indices = @transform_13, window_bounds = array<i64: 16, 16>}]} {
    %c0 = arith.constant 0 : index
    %c0_0 = arith.constant 0 : index
    %0 = vector.load %arg1[%c0, %c0_0] : memref<16x256xbf16, #tpu.memory_space<vmem>>, vector<16x256xbf16>
    %c0_1 = arith.constant 0 : index
    %c0_2 = arith.constant 0 : index
    %1 = vector.load %arg2[%c0_1, %c0_2] : memref<256x128xbf16, #tpu.memory_space<vmem>>, vector<256x128xbf16>
    %cst = arith.constant dense<0.000000e+00> : vector<16x128xf32>
    %2 = tpu.matmul %0, %1, %cst {dimension_numbers = #tpu.dot_dimension_numbers<[1], [0], [0], [1], [0, 0, 1, 1], [], []>} : vector<16x256xbf16>, vector<256x128xbf16>, vector<16x128xf32> -> vector<16x128xf32>
    %c0_3 = arith.constant 0 : index
    %c0_4 = arith.constant 0 : index
    %3 = vector.load %arg3[%c0_3, %c0_4] : memref<1x128xf32, #tpu.memory_space<vmem>>, vector<1x128xf32>
    %4 = vector.broadcast %3 : vector<1x128xf32> to vector<16x128xf32>
    %5 = arith.addf %2, %4 : vector<16x128xf32>
    %cst_5 = arith.constant 0.000000e+00 : f32
    %6 = vector.broadcast %cst_5 : f32 to vector<16x128xf32>
    %7 = arith.maximumf %5, %6 : vector<16x128xf32>
    %8 = arith.truncf %7 : vector<16x128xf32> to vector<16x128xbf16>
    %c0_6 = arith.constant 0 : index
    %c0_7 = arith.constant 0 : index
    %9 = vector.load %arg4[%c0_6, %c0_7] : memref<128x128xbf16, #tpu.memory_space<vmem>>, vector<128x128xbf16>
    %cst_8 = arith.constant dense<0.000000e+00> : vector<16x128xf32>
    %10 = tpu.matmul %8, %9, %cst_8 {dimension_numbers = #tpu.dot_dimension_numbers<[1], [0], [0], [1], [0, 0, 1, 1], [], []>} : vector<16x128xbf16>, vector<128x128xbf16>, vector<16x128xf32> -> vector<16x128xf32>
    %c0_9 = arith.constant 0 : index
    %c0_10 = arith.constant 0 : index
    %11 = vector.load %arg5[%c0_9, %c0_10] : memref<1x128xf32, #tpu.memory_space<vmem>>, vector<1x128xf32>
    %12 = vector.broadcast %11 : vector<1x128xf32> to vector<16x128xf32>
    %13 = arith.addf %10, %12 : vector<16x128xf32>
    %cst_11 = arith.constant 0.000000e+00 : f32
    %14 = vector.broadcast %cst_11 : f32 to vector<16x128xf32>
    %15 = arith.maximumf %13, %14 : vector<16x128xf32>
    %16 = arith.truncf %15 : vector<16x128xf32> to vector<16x128xbf16>
    %c0_12 = arith.constant 0 : index
    %c0_13 = arith.constant 0 : index
    %17 = vector.load %arg6[%c0_12, %c0_13] : memref<128x128xbf16, #tpu.memory_space<vmem>>, vector<128x128xbf16>
    %cst_14 = arith.constant dense<0.000000e+00> : vector<16x128xf32>
    %18 = tpu.matmul %16, %17, %cst_14 {dimension_numbers = #tpu.dot_dimension_numbers<[1], [0], [0], [1], [0, 0, 1, 1], [], []>} : vector<16x128xbf16>, vector<128x128xbf16>, vector<16x128xf32> -> vector<16x128xf32>
    %c0_15 = arith.constant 0 : index
    %c0_16 = arith.constant 0 : index
    %19 = vector.load %arg7[%c0_15, %c0_16] : memref<1x128xf32, #tpu.memory_space<vmem>>, vector<1x128xf32>
    %20 = vector.broadcast %19 : vector<1x128xf32> to vector<16x128xf32>
    %21 = arith.addf %18, %20 : vector<16x128xf32>
    %cst_17 = arith.constant 0.000000e+00 : f32
    %22 = vector.broadcast %cst_17 : f32 to vector<16x128xf32>
    %23 = arith.maximumf %21, %22 : vector<16x128xf32>
    %24 = arith.truncf %23 : vector<16x128xf32> to vector<16x128xbf16>
    %c0_18 = arith.constant 0 : index
    %c0_19 = arith.constant 0 : index
    %25 = vector.load %arg8[%c0_18, %c0_19] : memref<128x128xbf16, #tpu.memory_space<vmem>>, vector<128x128xbf16>
    %cst_20 = arith.constant dense<0.000000e+00> : vector<16x128xf32>
    %26 = tpu.matmul %24, %25, %cst_20 {dimension_numbers = #tpu.dot_dimension_numbers<[1], [0], [0], [1], [0, 0, 1, 1], [], []>} : vector<16x128xbf16>, vector<128x128xbf16>, vector<16x128xf32> -> vector<16x128xf32>
    %c0_21 = arith.constant 0 : index
    %c0_22 = arith.constant 0 : index
    %27 = vector.load %arg9[%c0_21, %c0_22] : memref<1x128xf32, #tpu.memory_space<vmem>>, vector<1x128xf32>
    %28 = vector.broadcast %27 : vector<1x128xf32> to vector<16x128xf32>
    %29 = arith.addf %26, %28 : vector<16x128xf32>
    %cst_23 = arith.constant 0.000000e+00 : f32
    %30 = vector.broadcast %cst_23 : f32 to vector<16x128xf32>
    %31 = arith.maximumf %29, %30 : vector<16x128xf32>
    %32 = arith.truncf %31 : vector<16x128xf32> to vector<16x128xbf16>
    %c0_24 = arith.constant 0 : index
    %c0_25 = arith.constant 0 : index
    %33 = vector.load %arg10[%c0_24, %c0_25] : memref<128x128xbf16, #tpu.memory_space<vmem>>, vector<128x128xbf16>
    %cst_26 = arith.constant dense<0.000000e+00> : vector<16x128xf32>
    %34 = tpu.matmul %32, %33, %cst_26 {dimension_numbers = #tpu.dot_dimension_numbers<[1], [0], [0], [1], [0, 0, 1, 1], [], []>} : vector<16x128xbf16>, vector<128x128xbf16>, vector<16x128xf32> -> vector<16x128xf32>
    %c0_27 = arith.constant 0 : index
    %c0_28 = arith.constant 0 : index
    %35 = vector.load %arg11[%c0_27, %c0_28] : memref<1x128xf32, #tpu.memory_space<vmem>>, vector<1x128xf32>
    %36 = vector.broadcast %35 : vector<1x128xf32> to vector<16x128xf32>
    %37 = arith.addf %34, %36 : vector<16x128xf32>
    %cst_29 = arith.constant 0.000000e+00 : f32
    %38 = vector.broadcast %cst_29 : f32 to vector<16x128xf32>
    %39 = arith.maximumf %37, %38 : vector<16x128xf32>
    %40 = arith.truncf %39 : vector<16x128xf32> to vector<16x128xbf16>
    %c0_30 = arith.constant 0 : index
    %c0_31 = arith.constant 0 : index
    %41 = vector.load %arg12[%c0_30, %c0_31] : memref<16x128xbf16, #tpu.memory_space<vmem>>, vector<16x128xbf16>
    %cst_32 = arith.constant dense<0.000000e+00> : vector<16x16xf32>
    %42 = tpu.matmul %41, %40, %cst_32 {dimension_numbers = #tpu.dot_dimension_numbers<[1], [1], [0], [0], [0, 0, 1, 0], [], []>} : vector<16x128xbf16>, vector<16x128xbf16>, vector<16x16xf32> -> vector<16x16xf32>
    %c0_33 = arith.constant 0 : index
    %c0_34 = arith.constant 0 : index
    %43 = vector.load %arg13[%c0_33, %c0_34] : memref<16x1xf32, #tpu.memory_space<vmem>>, vector<16x1xf32>
    %44 = vector.broadcast %43 : vector<16x1xf32> to vector<16x16xf32>
    %45 = arith.addf %42, %44 : vector<16x16xf32>
    %cst_35 = arith.constant dense<0xFF800000> : vector<16xf32>
    %46 = vector.multi_reduction <maximumf>, %45, %cst_35 [0] : vector<16x16xf32> to vector<16xf32>
    %47 = vector.shape_cast %46 : vector<16xf32> to vector<1x16xf32>
    %48 = vector.broadcast %47 : vector<1x16xf32> to vector<16x16xf32>
    %49 = arith.subf %45, %48 : vector<16x16xf32>
    %50 = math.exp %49 : vector<16x16xf32>
    %cst_36 = arith.constant dense<0.000000e+00> : vector<16xf32>
    %51 = vector.multi_reduction <add>, %50, %cst_36 [0] : vector<16x16xf32> to vector<16xf32>
    %52 = vector.shape_cast %51 : vector<16xf32> to vector<1x16xf32>
    %53 = math.log %52 : vector<1x16xf32>
    %54 = vector.broadcast %53 : vector<1x16xf32> to vector<16x16xf32>
    %55 = arith.subf %49, %54 : vector<16x16xf32>
    %c0_37 = arith.constant 0 : index
    %c0_38 = arith.constant 0 : index
    %56 = vector.load %arg14[%c0_37, %c0_38] : memref<16x16xf32, #tpu.memory_space<vmem>>, vector<16x16xf32>
    tpu.vector_store %arg14[%c0_37, %c0_38], %55 {strides = array<i32>} : memref<16x16xf32, #tpu.memory_space<vmem>>, vector<16x16xf32>,
    return
  }
  func.func @transform_0(%arg0: i32) -> (i32, i32) {
    %c0_i32 = arith.constant 0 : i32
    %c0_i32_0 = arith.constant 0 : i32
    return %arg0, %c0_i32 : i32, i32
  }
  func.func @transform_1(%arg0: i32) -> (i32, i32) {
    %c0_i32 = arith.constant 0 : i32
    %c0_i32_0 = arith.constant 0 : i32
    %c0_i32_1 = arith.constant 0 : i32
    return %c0_i32, %c0_i32_0 : i32, i32
  }
  func.func @transform_2(%arg0: i32) -> (i32, i32) {
    %c0_i32 = arith.constant 0 : i32
    %c0_i32_0 = arith.constant 0 : i32
    %c0_i32_1 = arith.constant 0 : i32
    return %c0_i32, %c0_i32_0 : i32, i32
  }
  func.func @transform_3(%arg0: i32) -> (i32, i32) {
    %c0_i32 = arith.constant 0 : i32
    %c0_i32_0 = arith.constant 0 : i32
    %c0_i32_1 = arith.constant 0 : i32
    return %c0_i32, %c0_i32_0 : i32, i32
  }
  func.func @transform_4(%arg0: i32) -> (i32, i32) {
    %c0_i32 = arith.constant 0 : i32
    %c0_i32_0 = arith.constant 0 : i32
    %c0_i32_1 = arith.constant 0 : i32
    return %c0_i32, %c0_i32_0 : i32, i32
  }
  func.func @transform_5(%arg0: i32) -> (i32, i32) {
    %c0_i32 = arith.constant 0 : i32
    %c0_i32_0 = arith.constant 0 : i32
    %c0_i32_1 = arith.constant 0 : i32
    return %c0_i32, %c0_i32_0 : i32, i32
  }
  func.func @transform_6(%arg0: i32) -> (i32, i32) {
    %c0_i32 = arith.constant 0 : i32
    %c0_i32_0 = arith.constant 0 : i32
    %c0_i32_1 = arith.constant 0 : i32
    return %c0_i32, %c0_i32_0 : i32, i32
  }
  func.func @transform_7(%arg0: i32) -> (i32, i32) {
    %c0_i32 = arith.constant 0 : i32
    %c0_i32_0 = arith.constant 0 : i32
    %c0_i32_1 = arith.constant 0 : i32
    return %c0_i32, %c0_i32_0 : i32, i32
  }
  func.func @transform_8(%arg0: i32) -> (i32, i32) {
    %c0_i32 = arith.constant 0 : i32
    %c0_i32_0 = arith.constant 0 : i32
    %c0_i32_1 = arith.constant 0 : i32
    return %c0_i32, %c0_i32_0 : i32, i32
  }
  func.func @transform_9(%arg0: i32) -> (i32, i32) {
    %c0_i32 = arith.constant 0 : i32
    %c0_i32_0 = arith.constant 0 : i32
    %c0_i32_1 = arith.constant 0 : i32
    return %c0_i32, %c0_i32_0 : i32, i32
  }
  func.func @transform_10(%arg0: i32) -> (i32, i32) {
    %c0_i32 = arith.constant 0 : i32
    %c0_i32_0 = arith.constant 0 : i32
    %c0_i32_1 = arith.constant 0 : i32
    return %c0_i32, %c0_i32_0 : i32, i32
  }
  func.func @transform_11(%arg0: i32) -> (i32, i32) {
    %c0_i32 = arith.constant 0 : i32
    %c0_i32_0 = arith.constant 0 : i32
    %c0_i32_1 = arith.constant 0 : i32
    return %c0_i32, %c0_i32_0 : i32, i32
  }
  func.func @transform_12(%arg0: i32) -> (i32, i32) {
    %c0_i32 = arith.constant 0 : i32
    %c0_i32_0 = arith.constant 0 : i32
    %c0_i32_1 = arith.constant 0 : i32
    return %c0_i32, %c0_i32_0 : i32, i32
  }
  func.func @transform_13(%arg0: i32) -> (i32, i32) {
    %c0_i32 = arith.constant 0 : i32
    %c0_i32_0 = arith.constant 0 : i32
    return %c0_i32, %arg0 : i32, i32
  }
}

</mosaic_0001>

<bundles_post_ra>
// kernel: tpu_custom_call.1
= control target key start
LH: loop header
LB: loop body
LE: loop exit
PB: predicated region body
PF: predicated region fallthrough
CT: control target
= control target key end

     0   :  { %18 = vsyncpa [#allocation3], 0  ;;  %s1475_s0 = inlined_call_operand.vmem [shape: bf16[16,256], index: 0, kind: input, shape index: {}]   ;;  %s1476_s1 = inlined_call_operand.hbm [shape: bf16[256,128], index: 1, kind: input, shape index: {}]   ;;  %s1477_s2 = inlined_call_operand.vmem [shape: f32[1,128], index: 2, kind: input, shape index: {}]   ;;  %s1478_s3 = inlined_call_operand.hbm [shape: bf16[128,128], index: 3, kind: input, shape index: {}]   ;;  %s1479_s4 = inlined_call_operand.hbm [shape: f32[1,128], index: 4, kind: input, shape index: {}]   ;;  %s1480_s5 = inlined_call_operand.hbm [shape: bf16[128,128], index: 5, kind: input, shape index: {}]   ;;  %s1481_s6 = inlined_call_operand.hbm [shape: f32[1,128], index: 6, kind: input, shape index: {}]   ;;  %s1482_s7 = inlined_call_operand.hbm [shape: bf16[128,128], index: 7, kind: input, shape index: {}]   ;;  %s1483_s8 = inlined_call_operand.hbm [shape: f32[1,128], index: 8, kind: input, shape index: {}]   ;;  %s1484_s9 = inlined_call_operand.hbm [shape: bf16[128,128], index: 9, kind: input, shape index: {}]   ;;  %s1485_s10 = inlined_call_operand.hbm [shape: f32[1,128], index: 10, kind: input, shape index: {}]   ;;  %s1486_s11 = inlined_call_operand.vmem [shape: bf16[16,128], index: 11, kind: input, shape index: {}]   ;;  %s1487_s12 = inlined_call_operand.vmem [shape: f32[16,1], index: 12, kind: input, shape index: {}]   ;;  %s1488_s13 = inlined_call_operand.hbm [shape: f32[16,16], index: 13, kind: output, shape index: {}]  }
   0x1   :  { %19 = vsyncpa [#allocation6], 0 }
   0x2   :  { %20 = vsyncpa [#allocation9], 0 }
   0x3   :  { %21 = vsyncpa [#allocation12], 0 }
   0x4   :  { %22 = vsyncpa [#allocation15], 0 }
   0x5   :  { %23 = vsyncpa [#allocation4], 0  ;;  %s45_s27 = sshll.u32 %s1478_s3, 4  ;;  %s1315_s28 = smov [#allocation5]   ;;  %s46_s27 = int_to_ptr.hbm [resolvable:$true] %s45_s27 }
   0x6   :  { %s47_s29 = sshll.u32 %s1315_s28, 4  ;;  %s69_s15 = sshll.u32 %s1480_s5, 4  ;;  %s48_s29 = int_to_ptr.vmem [resolvable:$true] %s47_s29  ;;  %s70_s15 = int_to_ptr.hbm [resolvable:$true] %s69_s15 }
   0x7   :  { %s1316_s16 = smov 64   ;;  %s1317_s17 = smov 4  }
   0x8   :  { %53 = dma.hbm_to_vmem [thread:$0]  %s46_s27, 1024, %s48_s29, [#allocation6], %s1316_s16, %s1316_s16, %s1317_s17  }
   0x9   :  { %s1318_s18 = smov [#allocation8]   ;;  %s93_s3 = sshll.u32 %s1482_s7, 4  ;;  %s94_s3 = int_to_ptr.hbm [resolvable:$true] %s93_s3 }
   0xa   :  { %s71_s19 = sshll.u32 %s1318_s18, 4  ;;  %s117_s23 = sshll.u32 %s1484_s9, 4  ;;  %s72_s19 = int_to_ptr.vmem [resolvable:$true] %s71_s19  ;;  %s118_s23 = int_to_ptr.hbm [resolvable:$true] %s117_s23 }
   0xb   :  { %77 = dma.hbm_to_vmem [thread:$0]  %s70_s15, 1024, %s72_s19, [#allocation9], %s1316_s16, %s1316_s16, %s1317_s17  }
   0xc   :  { %s1319_s24 = smov [#allocation11]   ;;  %s1320_s26 = smov [#allocation14]  }
   0xd   :  { %s95_s25 = sshll.u32 %s1319_s24, 4  ;;  %s119_s7 = sshll.u32 %s1320_s26, 4  ;;  %s96_s25 = int_to_ptr.vmem [resolvable:$true] %s95_s25  ;;  %s120_s7 = int_to_ptr.vmem [resolvable:$true] %s119_s7 }
   0xe   :  { %101 = dma.hbm_to_vmem [thread:$0]  %s94_s3, 1024, %s96_s25, [#allocation12], %s1316_s16, %s1316_s16, %s1317_s17  }
   0xf   :  { %s30_s29 = sshll.u32 %s1476_s1, 4  ;;  %s59_s14 = sshll.u32 %s1479_s4, 4  ;;  %s31_s29 = int_to_ptr.hbm [resolvable:$true] %s30_s29  ;;  %s60_s14 = int_to_ptr.hbm [resolvable:$true] %s59_s14 }
  0x10   :  { %125 = dma.hbm_to_vmem [thread:$0]  %s118_s23, 1024, %s120_s7, [#allocation15], %s1316_s16, %s1316_s16, %s1317_s17  }
  0x11   :  { %s1321_s15 = smov [#allocation2]   ;;  %s1322_s19 = smov [#allocation7]  }
  0x12   :  { %s32_s18 = sshll.u32 %s1321_s15, 4  ;;  %s61_s1 = sshll.u32 %s1322_s19, 4  ;;  %s33_s18 = int_to_ptr.vmem [resolvable:$true] %s32_s18  ;;  %s62_s1 = int_to_ptr.vmem [resolvable:$true] %s61_s1 }
  0x13   :  { %38 = dma.hbm_to_vmem [thread:$0]  %s31_s29, 2048, %s33_s18, [#allocation3], %s1316_s16, %s1316_s16, %s1317_s17  }
  0x14   :  { %s83_s3 = sshll.u32 %s1481_s6, 4  ;;  %s107_s4 = sshll.u32 %s1483_s8, 4  ;;  %s84_s3 = int_to_ptr.hbm [resolvable:$true] %s83_s3  ;;  %s108_s4 = int_to_ptr.hbm [resolvable:$true] %s107_s4 }
  0x15   :  { %64 = dma.hbm_to_vmem [thread:$0]  %s60_s14, 16, %s62_s1, [#allocation6]  }
  0x16   :  { %s1323_s23 = smov [#allocation10]   ;;  %s1324_s25 = smov [#allocation13]  }
  0x17   :  { %s85_s24 = sshll.u32 %s1323_s23, 4  ;;  %s109_s16 = sshll.u32 %s1324_s25, 4  ;;  %s86_s24 = int_to_ptr.vmem [resolvable:$true] %s85_s24  ;;  %s110_s16 = int_to_ptr.vmem [resolvable:$true] %s109_s16 }
  0x18   :  { %88 = dma.hbm_to_vmem [thread:$0]  %s84_s3, 16, %s86_s24, [#allocation9]  }
  0x19   :  { %s131_s7 = sshll.u32 %s1485_s10, 4  ;;  %s1325_s6 = smov [#allocation16]   ;;  %s132_s7 = int_to_ptr.hbm [resolvable:$true] %s131_s7 }
  0x1a   :  { %112 = dma.hbm_to_vmem [thread:$0]  %s108_s4, 16, %s110_s16, [#allocation12]  }
  0x1b   :  { %s133_s27 = sshll.u32 %s1325_s6, 4  ;;  %s134_s27 = int_to_ptr.vmem [resolvable:$true] %s133_s27 }
  0x1c   :  { %136 = dma.hbm_to_vmem [thread:$0]  %s132_s7, 16, %s134_s27, [#allocation15]  }
  0x1d   :  { %1303 = dma.done.wait [#allocation3], 2048  }
  0x1e   :  { %1304 = vsyncadd [#allocation3], 4294965248 }
  0x1f   :  { %1305 = dma.done.wait [#allocation6], 1040  }
  0x20   :  { %1306 = vsyncadd [#allocation6], 4294966256 }
  0x21   :  { %1307 = dma.done.wait [#allocation9], 1040  }
  0x22   :  { %1308 = vsyncadd [#allocation9], 4294966256 }
  0x23   :  { %1309 = dma.done.wait [#allocation12], 1040  }
  0x24   :  { %1310 = vsyncadd [#allocation12], 4294966256 }
  0x25   :  { %1311 = dma.done.wait [#allocation15], 1040  }
  0x26   :  { %1312 = vsyncadd [#allocation15], 4294966256  ;;  %v994_v0 = vld [vmem:[#allocation2 + $0x38] sm:$0xff]  ;;  %v993_v2 = vld [vmem:[#allocation2 + $0x30] sm:$0xff]  ;;  %vm727_vm0 = vcmask 130048   ;;  %s764_s4 = sshll.u32 %s1488_s13, 4  ;;  %s765_s4 = int_to_ptr.hbm [resolvable:$true] %s764_s4 }
  0x27   :  { %v1002_v1 = vld [vmem:[#allocation2 + $0x78] sm:$0xff]  ;;  %322 = vmatpush.bf16.msra.mxu0 %v994_v0  ;;  %v1001_v3 = vld [vmem:[#allocation2 + $0x70] sm:$0xff]  ;;  %v992_v4 = vld [vmem:[#allocation2 + $0x28] sm:$0xff]  ;;  %s1328_s23 = smov 128   ;;  %s1329_s24 = smov 8  }
  0x28   :  { %336 = vmatpush.bf16.msra.mxu1 %v1002_v1  ;;  %v1000_v5 = vld [vmem:[#allocation2 + $0x68] sm:$0xff]  ;;  %v1010_v6 = vld [vmem:[#allocation5 + $0x38] sm:$0xff]  ;;  %v1009_v7 = vld [vmem:[#allocation5 + $0x30] sm:$0xff] }
  0x29   :  { %421 = vmatpush.bf16.msra.mxu2 %v1010_v6  ;;  %v991_v8 = vld [vmem:[#allocation2 + $0x20] sm:$0xff]  ;;  %v1008_v10 = vld [vmem:[#allocation5 + $0x28] sm:$0xff]  ;;  %v990_v11 = vld [vmem:[#allocation2 + $0x18] sm:$0xff] }
  0x2a   :  { %v999_v9 = vld [vmem:[#allocation2 + $0x60] sm:$0xff]  ;;  %v998_v12 = vld [vmem:[#allocation2 + $0x58] sm:$0xff]  ;;  %v989_v14 = vld [vmem:[#allocation2 + $0x10] sm:$0xff] }
  0x2b   :  { %323 = vmatpush.bf16.msra.mxu0 %v993_v2  ;;  %v1007_v13 = vld [vmem:[#allocation5 + $0x20] sm:$0xff]  ;;  %v997_v15 = vld [vmem:[#allocation2 + $0x50] sm:$0xff]  ;;  %v988_v16 = vld [vmem:[#allocation2 + $0x8] sm:$0xff] }
  0x2c   :  { %337 = vmatpush.bf16.msra.mxu1 %v1001_v3  ;;  %v996_v17 = vld [vmem:[#allocation2 + $0x48] sm:$0xff]  ;;  %v987_v18 = vld [vmem:[#allocation2] sm:$0xff]  ;;  %v1006_v26 = vld [vmem:[#allocation5 + $0x18] sm:$0xff] }
  0x2d   :  { %422 = vmatpush.bf16.msra.mxu2 %v1009_v7  ;;  %v995_v19 = vld [vmem:[#allocation2 + $0x40] sm:$0xff]  ;;  %v986_v21 = vld [vmem:[%s1475_s0 + $0x4] sm:$0xf0]  ;;  %v785_v23 = vld [vmem:[%s1475_s0 + $0x8] sm:$0xf0] }
  0x2e   :  { %v783_v20 = vld [vmem:[%s1475_s0] sm:$0xf]  ;;  %v985_v22 = vld [vmem:[%s1475_s0 + $0x4] sm:$0xf]  ;;  %v1005_v27 = vld [vmem:[#allocation5 + $0x10] sm:$0xff] }
  0x2f   :  { %324 = vmatpush.bf16.msra.mxu0 %v992_v4  ;;  %v784_v24 = vor.u32 %v986_v21, %v783_v20  ;;  %v788_v25 = vor.u32 %v985_v22, %v785_v23  ;;  %v1004_v28 = vld [vmem:[#allocation5 + $0x8] sm:$0xff]  ;;  %v1003_v29 = vld [vmem:[#allocation5] sm:$0xff]  ;;  %v1017_v31 = vld [vmem:[#allocation8 + $0x30] sm:$0xff] }
  0x30   :  { %338 = vmatpush.bf16.msra.mxu1 %v1000_v5  ;;  %v1018_v30 = vld [vmem:[#allocation8 + $0x38] sm:$0xff]  ;;  %v1016_v32 = vld [vmem:[#allocation8 + $0x28] sm:$0xff]  ;;  %v1015_v33 = vld [vmem:[#allocation8 + $0x20] sm:$0xff] }
  0x31   :  { %423 = vmatpush.bf16.msra.mxu2 %v1008_v10  ;;  %506 = vmatpush.bf16.msra.mxu3 %v1018_v30  ;;  %v1052_v36 = vld [vmem:[%s1477_s2] ss:$0 sm:$0xff]  ;;  %v1013_v47 = vld [vmem:[#allocation8 + $0x10] sm:$0xff]  ;;  %v1012_v48 = vld [vmem:[#allocation8 + $0x8] sm:$0xff] }
  0x32   :  { %v1014_v46 = vld [vmem:[#allocation8 + $0x18] sm:$0xff]  ;;  %v1011_v49 = vld [vmem:[#allocation8] sm:$0xff]  ;;  %v1024_v52 = vld [vmem:[#allocation11 + $0x28] sm:$0xff] }
  0x33   :  { %325 = vmatpush.bf16.msra.mxu0 %v991_v8  ;;  %v1026_v50 = vld [vmem:[#allocation11 + $0x38] sm:$0xff]  ;;  %v1025_v51 = vld [vmem:[#allocation11 + $0x30] sm:$0xff]  ;;  %v1023_v53 = vld [vmem:[#allocation11 + $0x20] sm:$0xff] }
  0x34   :  { %339 = vmatpush.bf16.msra.mxu1 %v999_v9  ;;  %v1053_v55 = vld [vmem:[#allocation7] ss:$0 sm:$0xff]  ;;  %v1021_v63 = vld [vmem:[#allocation11 + $0x10] sm:$0xff]  ;;  %v1020_v0 = vld [vmem:[#allocation11 + $0x8] sm:$0xff] }
  0x35   :  { %424 = vmatpush.bf16.msra.mxu2 %v1007_v13  ;;  %507 = vmatpush.bf16.msra.mxu3 %v1017_v31  ;;  %v1022_v62 = vld [vmem:[#allocation11 + $0x18] sm:$0xff]  ;;  %v1019_v1 = vld [vmem:[#allocation11] sm:$0xff]  ;;  %v1032_v4 = vld [vmem:[#allocation14 + $0x28] sm:$0xff] }
  0x36   :  { %v1034_v2 = vld [vmem:[#allocation14 + $0x38] sm:$0xff]  ;;  %v1033_v3 = vld [vmem:[#allocation14 + $0x30] sm:$0xff]  ;;  %v1031_v5 = vld [vmem:[#allocation14 + $0x20] sm:$0xff] }
  0x37   :  { %326 = vmatpush.bf16.msra.mxu0 %v990_v11  ;;  %v1054_v7 = vld [vmem:[#allocation10] ss:$0 sm:$0xff]  ;;  %v1056_v30 = vld [vmem:[#allocation16] ss:$0 sm:$0xff] }
  0x38   :  { %340 = vmatpush.bf16.msra.mxu1 %v998_v12 }
  0x39   :  { %425 = vmatpush.bf16.msra.mxu2 %v1006_v26  ;;  %508 = vmatpush.bf16.msra.mxu3 %v1016_v32  ;;  %v695_v26 = vld [vmem:[%s1487_s12] sm:$0xff] }
  0x3b   :  { %327 = vmatpush.bf16.msra.mxu0 %v989_v14  ;;  %v1030_v14 = vld [vmem:[#allocation14 + $0x18] sm:$0xff] }
  0x3c   :  { %341 = vmatpush.bf16.msra.mxu1 %v997_v15  ;;  %v1029_v15 = vld [vmem:[#allocation14 + $0x10] sm:$0xff] }
  0x3d   :  { %426 = vmatpush.bf16.msra.mxu2 %v1005_v27  ;;  %509 = vmatpush.bf16.msra.mxu3 %v1015_v33  ;;  %v1326_v27 = vmov 0  }
  0x3e   :  { %1051 = vset.pattern.permute.xlu0 %v1326_v27 }
  0x3f   :  { %328 = vmatpush.bf16.msra.mxu0 %v988_v16  ;;  %v1028_v16 = vld [vmem:[#allocation14 + $0x8] sm:$0xff]  ;;  %699 = vperm.xlu0 %1051, %v695_v26  }
  0x40   :  { %342 = vmatpush.bf16.msra.mxu1 %v996_v17  ;;  %v1027_v17 = vld [vmem:[#allocation14] sm:$0xff] }
  0x41   :  { %427 = vmatpush.bf16.msra.mxu2 %v1004_v28  ;;  %510 = vmatpush.bf16.msra.mxu3 %v1014_v46  ;;  %v696_v28 = vld [vmem:[%s1487_s12 + $0x8] sm:$0xff] }
  0x43   :  { %329 = vmatpush.bf16.msra.mxu0 %v987_v18 }
  0x44   :  { %343 = vmatpush.bf16.msra.mxu1 %v995_v19  ;;  %v1055_v19 = vld [vmem:[#allocation13] ss:$0 sm:$0xff] }
  0x45   :  { %428 = vmatpush.bf16.msra.mxu2 %v1003_v29  ;;  %511 = vmatpush.bf16.msra.mxu3 %v1013_v47 }
  0x46   :  { %330 = vmatmul.bf16.vlgmr.msra.gmra.mxu0 %v784_v24 }
  0x47   :  { %344 = vmatmul.bf16.vlgmr.msra.gmra.mxu1 %v788_v25  ;;  %591 = vmatpush.bf16.msrb.mxu0 %v1026_v50 }
  0x48   :  { %676 = vmatpush.bf16.msrb.mxu1 %v1034_v2  ;;  %704 = vperm.xlu0 %1051, %v696_v28  }
  0x49   :  { %512 = vmatpush.bf16.msra.mxu3 %v1012_v48 }
  0x4b   :  { %592 = vmatpush.bf16.msrb.mxu0 %v1025_v51 }
  0x4c   :  { %677 = vmatpush.bf16.msrb.mxu1 %v1033_v3 }
  0x4d   :  { %513 = vmatpush.bf16.msra.mxu3 %v1011_v49 }
  0x4f   :  { %593 = vmatpush.bf16.msrb.mxu0 %v1024_v52 }
  0x50   :  { %678 = vmatpush.bf16.msrb.mxu1 %v1032_v4 }
  0x53   :  { %594 = vmatpush.bf16.msrb.mxu0 %v1023_v53 }
  0x54   :  { %679 = vmatpush.bf16.msrb.mxu1 %v1031_v5 }
  0x57   :  { %595 = vmatpush.bf16.msrb.mxu0 %v1022_v62 }
  0x58   :  { %680 = vmatpush.bf16.msrb.mxu1 %v1030_v14 }
  0x5b   :  { %596 = vmatpush.bf16.msrb.mxu0 %v1021_v63 }
  0x5c   :  { %681 = vmatpush.bf16.msrb.mxu1 %v1029_v15 }
  0x5f   :  { %597 = vmatpush.bf16.msrb.mxu0 %v1020_v0 }
  0x60   :  { %682 = vmatpush.bf16.msrb.mxu1 %v1028_v16 }
  0x63   :  { %598 = vmatpush.bf16.msrb.mxu0 %v1019_v1 }
  0x64   :  { %683 = vmatpush.bf16.msrb.mxu1 %v1027_v17 }
  0xc3   :  { %v331_v34 = vpop.f32.mrf.mxu0 }
  0xc4   :  { %v345_v35 = vpop.f32.mrf.mxu1  ;;  %v332_v37 = vadd.f32 %v1052_v36, %v331_v34 }
  0xc6   :  { %v346_v39 = vadd.f32 %v345_v35, %v332_v37  ;;  %v1035_v37 = vld [vmem:[%s1486_s11] sm:$0xff]  ;;  %s1327_s11 = smov [#allocation17]  }
  0xc7   :  { %s762_s12 = sshll.u32 %s1327_s11, 4  ;;  %s763_s12 = int_to_ptr.vmem [resolvable:$true] %s762_s12 }
  0xc8   :  { %v350_v43 = vmax.f32 %v346_v39, 0.0 }
  0xcb   :  { %v333_v38 = vpop.f32.mrf.mxu0 }
  0xcc   :  { %v334_v40 = vadd.f32 %v1052_v36, %v333_v38  ;;  %v347_v41 = vpop.f32.mrf.mxu1  ;;  %v700_v38 = vpop.permute.xlu0 %699 }
  0xce   :  { %v348_v42 = vadd.f32 %v347_v41, %v334_v40 }
  0xd0   :  { %v351_v44 = vmax.f32 %v348_v42, 0.0 }
  0xd2   :  { %v352_v45 = vpack.c.bf16 %v351_v44, %v350_v43 }
  0xd4   :  { %429 = vmatmul.bf16.vlgmr.msra.gmra.mxu2 %v352_v45  ;;  %v705_v41 = vpop.permute.xlu0 %704 }
 0x157   :  { %v430_v54 = vpop.f32.mrf.mxu2 }
 0x158   :  { %v431_v56 = vadd.f32 %v1053_v55, %v430_v54 }
 0x15a   :  { %v435_v59 = vmax.f32 %v431_v56, 0.0 }
 0x15f   :  { %v432_v57 = vpop.f32.mrf.mxu2 }
 0x160   :  { %v433_v58 = vadd.f32 %v1053_v55, %v432_v57 }
 0x162   :  { %v436_v60 = vmax.f32 %v433_v58, 0.0 }
 0x164   :  { %v437_v61 = vpack.c.bf16 %v436_v60, %v435_v59 }
 0x166   :  { %514 = vmatmul.bf16.vlgmr.msra.gmra.mxu3 %v437_v61 }
 0x1e9   :  { %v515_v6 = vpop.f32.mrf.mxu3 }
 0x1ea   :  { %v516_v8 = vadd.f32 %v1054_v7, %v515_v6 }
 0x1ec   :  { %v520_v11 = vmax.f32 %v516_v8, 0.0 }
 0x1f1   :  { %v517_v9 = vpop.f32.mrf.mxu3 }
 0x1f2   :  { %v518_v10 = vadd.f32 %v1054_v7, %v517_v9 }
 0x1f4   :  { %v521_v12 = vmax.f32 %v518_v10, 0.0 }
 0x1f6   :  { %v522_v13 = vpack.c.bf16 %v521_v12, %v520_v11 }
 0x1f8   :  { %599 = vmatmul.bf16.vlgmr.msrb.gmra.mxu0 %v522_v13 }
 0x275   :  { %v600_v18 = vpop.f32.mrf.mxu0 }
 0x276   :  { %v601_v20 = vadd.f32 %v1055_v19, %v600_v18 }
 0x278   :  { %v605_v23 = vmax.f32 %v601_v20, 0.0 }
 0x27d   :  { %v602_v21 = vpop.f32.mrf.mxu0 }
 0x27e   :  { %v603_v22 = vadd.f32 %v1055_v19, %v602_v21 }
 0x280   :  { %v606_v24 = vmax.f32 %v603_v22, 0.0 }
 0x282   :  { %v607_v25 = vpack.c.bf16 %v606_v24, %v605_v23 }
 0x284   :  { %684 = vmatmul.bf16.vlgmr.msrb.gmra.mxu1 %v607_v25 }
 0x301   :  { %v685_v29 = vpop.f32.mrf.mxu1 }
 0x302   :  { %v686_v31 = vadd.f32 %v1056_v30, %v685_v29 }
 0x304   :  { %v690_v34 = vmax.f32 %v686_v31, 0.0 }
 0x309   :  { %v687_v32 = vpop.f32.mrf.mxu1 }
 0x30a   :  { %v688_v33 = vadd.f32 %v1056_v30, %v687_v32 }
 0x30c   :  { %v691_v35 = vmax.f32 %v688_v33, 0.0 }
 0x30e   :  { %v692_v36 = vpack.c.bf16 %v691_v35, %v690_v34 }
 0x310   :  { %720 = vmatpush.bf16.xpose.msrb.mxu2 %v692_v36 }
 0x317   :  { %721 = vmatmul.bf16.vlgmr.msrb.gmra.mxu2 %v1035_v37 }
 0x39a   :  { %v722_v39 = vpop.f32.mrf.mxu2 }
 0x39b   :  { %v723_v40 = vadd.f32 %v722_v39, %v700_v38 }
 0x39d   :  { %v728_v44 = vsel %vm727_vm0, %v723_v40, -inf }
 0x3a2   :  { %v724_v42 = vpop.f32.mrf.mxu2 }
 0x3a3   :  { %v725_v43 = vadd.f32 %v724_v42, %v705_v41 }
 0x3a5   :  { %v729_v45 = vsel %vm727_vm0, %v725_v43, -inf }
 0x3a6   :  { %v730_v46 = vmax.f32 %v728_v44, %v729_v45 }
 0x3a8   :  { %v731_v47 = vrot.slane %v730_v46, 4 }
 0x3aa   :  { %v732_v48 = vmax.f32 %v730_v46, %v731_v47 }
 0x3ac   :  { %v733_v49 = vrot.slane %v732_v48, 2 }
 0x3ae   :  { %v734_v50 = vmax.f32 %v732_v48, %v733_v49 }
 0x3b0   :  { %v735_v51 = vrot.slane %v734_v50, 1 }
 0x3b2   :  { %v736_v52 = vmax.f32 %v734_v50, %v735_v51 }
 0x3b4   :  { %v737_v53 = vsub.f32 %v723_v40, %v736_v52  ;;  %v738_v54 = vsub.f32 %v725_v43, %v736_v52 }
 0x3b6   :  { %v739_v55 = vmul.f32 1.442695, %v737_v53  ;;  %v741_v56 = vmul.f32 1.442695, %v738_v54 }
 0x3b8   :  { %1057 = vpow2.f32 %v739_v55 }
 0x3b9   :  { %1059 = vpow2.f32 %v741_v56 }
 0x3be   :  { %v1058_v57 = vpop.eup %1057 }
 0x3bf   :  { %v1060_v58 = vpop.eup %1059  ;;  %v743_v59 = vsel %vm727_vm0, %v1058_v57, 0.0 }
 0x3c0   :  { %v744_v60 = vsel %vm727_vm0, %v1060_v58, 0.0 }
 0x3c1   :  { %v745_v61 = vadd.f32 %v744_v60, %v743_v59 }
 0x3c3   :  { %v746_v62 = vrot.slane %v745_v61, 4 }
 0x3c5   :  { %v747_v63 = vadd.f32 %v746_v62, %v745_v61 }
 0x3c7   :  { %v748_v0 = vrot.slane %v747_v63, 2 }
 0x3c9   :  { %v749_v1 = vadd.f32 %v748_v0, %v747_v63 }
 0x3cb   :  { %v750_v2 = vrot.slane %v749_v1, 1 }
 0x3cd   :  { %v751_v3 = vadd.f32 %v750_v2, %v749_v1 }
 0x3cf   :  { %1061 = vlog2.f32 %v751_v3 }
 0x3d5   :  { %v1062_v4 = vpop.eup %1061 }
 0x3d6   :  { %v753_v5 = vmul.f32 0.6931472, %v1062_v4 }
 0x3d8   :  { %v754_v6 = vsub.f32 %v737_v53, %v753_v5  ;;  %v755_v7 = vsub.f32 %v738_v54, %v753_v5 }
 0x3da   :  { %757 = vst.msk [vmem:[#allocation17 + $0x8] sm:$0xff] %vm727_vm0, %v755_v7 }
 0x3db   :  { %756 = vst.msk [vmem:[#allocation17] sm:$0xff] %vm727_vm0, %v754_v6 }
 0x3dc   :  { %770 = dma.vmem_to_hbm [thread:$0]  %s763_s12, 256, %s765_s4, [#allocation4], %s1328_s23, %s1328_s23, %s1329_s24  }
 0x3dd   :  { %1313 = dma.done.wait [#allocation4], 256  }
 0x3de   :  { %1314 = vsyncadd [#allocation4], 4294967040 }
 0x3df   :  { %775 = vsyncpa [#allocation3], 1 }
 0x3e0   :  { %776 = vsyncpa [#allocation6], 1 }
 0x3e1   :  { %777 = vsyncpa [#allocation9], 1 }
 0x3e2   :  { %778 = vsyncpa [#allocation12], 1 }
 0x3e3   :  { %779 = vsyncpa [#allocation15], 1 }
 0x3e4   :  { %780 = vsyncpa [#allocation4], 1 }

</bundles_post_ra>
